<compile_context>
chip_gen: v5e
topology: v5e:2x2
jax: 0.10.0
libtpu: 0.0.40
codegen_flags: <defaults>
</compile_context>

<pallas_src>
import jax
import jax.numpy as jnp
import numpy as np
from jax.experimental import pallas as pl
from jax.experimental.pallas import tpu as pltpu


# ---------------------------------------------------------------------------
# Kernel
# ---------------------------------------------------------------------------
def _gelu_exact(x):
    # Matches torch.nn.GELU() default (erf-based), computed in f32.
    return 0.5 * x * (1.0 + jax.lax.erf(x * (1.0 / np.sqrt(2.0))))


def ffn_kernel(x_ref, w1_ref, b1_ref, w2_ref, b2_ref, o_ref, acc_ref):
    """out[i] = GELU(x[i] @ W1 + b1) @ W2 + b2, accumulated over hidden-dim chunks."""
    j = pl.program_id(1)  # hidden-chunk index (reduction axis for the 2nd matmul)

    @pl.when(j == 0)
    def _():
        acc_ref[...] = jnp.zeros_like(acc_ref)

    # (TM, TH) chunk of the hidden activation, f32 accumulation on the MXU.
    h = jnp.dot(x_ref[...], w1_ref[...], preferred_element_type=jnp.float32)
    h = _gelu_exact(h + b1_ref[...])

    # Accumulate this chunk's contribution to the (TM, D_out) output.
    acc_ref[...] += jnp.dot(
        h.astype(w2_ref.dtype), w2_ref[...], preferred_element_type=jnp.float32
    )

    @pl.when(j == pl.num_programs(1) - 1)
    def _():
        o_ref[...] = (acc_ref[...] + b2_ref[...]).astype(o_ref.dtype)


# ---------------------------------------------------------------------------
# Generation-aware configuration
# ---------------------------------------------------------------------------
def _round_up(n, k):
    return ((n + k - 1) // k) * k


def _tpu_config():
    """Pick (row_tile, hidden_tile, vmem_limit, two_cores) from the hardware."""
    vmem_bytes = None
    kind = ""
    try:
        vmem_bytes = int(pltpu.get_tpu_info().vmem_capacity_bytes)
    except Exception:
        pass
    try:
        kind = jax.devices()[0].device_kind.lower()
    except Exception:
        pass
    if vmem_bytes is None or vmem_bytes <= 0:
        vmem_bytes = 64 * 1024 * 1024  # conservative floor (v7x per-TC VMEM)

    two_cores = "v7" in kind
    small_vmem = vmem_bytes < 100 * 1024 * 1024 or two_cores
    vmem_limit = int(min(vmem_bytes * 0.8, 100 * 1024 * 1024))

    if small_vmem:
        # v7x-class: already compute-bound at tm=512; keep per-step footprint small.
        return dict(row_tile=512, hidden_tile=256, vmem_limit=vmem_limit,
                    two_cores=True)
    # v5e / v6e: 128 MiB VMEM; v6e needs tm >= 1024 to clear the weight-streaming roofline.
    return dict(row_tile=1024, hidden_tile=512, vmem_limit=vmem_limit,
                two_cores=False)


# ---------------------------------------------------------------------------
# Wrapper
# ---------------------------------------------------------------------------
def feedforward(x, w1, b1, w2, b2, *, compute_dtype=jnp.bfloat16, out_dtype=None,
                row_tile=None, hidden_tile=None, vmem_limit_bytes=None):
    """FeedForward forward pass. x: (..., dim); w1: (dim, 4*dim); w2: (4*dim, dim)."""
    cfg = _tpu_config()
    row_tile = row_tile or cfg["row_tile"]
    hidden_tile = hidden_tile or cfg["hidden_tile"]
    vmem_limit_bytes = vmem_limit_bytes or cfg["vmem_limit"]
    out_dtype = out_dtype or x.dtype

    orig_shape = x.shape
    d_in = orig_shape[-1]
    hidden = w1.shape[1]
    d_out = w2.shape[1]
    m = int(np.prod(orig_shape[:-1]))

    # ---- tile selection (sublane/lane aligned), with padding instead of fallbacks ----
    if m >= row_tile:
        tm = row_tile
    else:
        tm = _round_up(m, 8)
    m_pad = _round_up(m, tm)
    # Keep grid[0] >= 2 on dual-TensorCore chips so the "parallel" axis can shard.
    if cfg["two_cores"] and (m_pad // tm) < 2 and m > 8:
        tm = max(8, _round_up((m + 1) // 2, 8))
        m_pad = _round_up(m, tm)

    if hidden >= hidden_tile:
        th = hidden_tile                      # multiple of 128 by construction
        hidden_pad = _round_up(hidden, th)
    else:
        hidden_pad = _round_up(hidden, 128)
        th = hidden_pad

    # ---- operand prep: cast only if needed (store weights in bf16 to avoid per-call cost) ----
    xc = x.reshape(m, d_in)
    if xc.dtype != compute_dtype:
        xc = xc.astype(compute_dtype)
    w1c = w1 if w1.dtype == compute_dtype else w1.astype(compute_dtype)
    w2c = w2 if w2.dtype == compute_dtype else w2.astype(compute_dtype)
    b1f = b1.reshape(1, hidden).astype(jnp.float32)
    b2f = b2.reshape(1, d_out).astype(jnp.float32)

    # Zero-pad rows / hidden to tile multiples (GELU(0) = 0 -> padded hidden adds nothing;
    # padded rows are sliced off below).
    if m_pad != m:
        xc = jnp.pad(xc, ((0, m_pad - m), (0, 0)))
    if hidden_pad != hidden:
        hp = hidden_pad - hidden
        w1c = jnp.pad(w1c, ((0, 0), (0, hp)))
        b1f = jnp.pad(b1f, ((0, 0), (0, hp)))
        w2c = jnp.pad(w2c, ((0, hp), (0, 0)))

    grid = (m_pad // tm, hidden_pad // th)

    out = pl.pallas_call(
        ffn_kernel,
        grid_spec=pltpu.PrefetchScalarGridSpec(
            num_scalar_prefetch=0,
            grid=grid,
            in_specs=[
                pl.BlockSpec((tm, d_in), lambda i, j: (i, 0)),    # x rows (const over j)
                pl.BlockSpec((d_in, th), lambda i, j: (0, j)),    # W1 column chunk
                pl.BlockSpec((1, th), lambda i, j: (0, j)),       # b1 chunk
                pl.BlockSpec((th, d_out), lambda i, j: (j, 0)),   # W2 row chunk
                pl.BlockSpec((1, d_out), lambda i, j: (0, 0)),    # b2
            ],
            out_specs=pl.BlockSpec((tm, d_out), lambda i, j: (i, 0)),
            scratch_shapes=[pltpu.VMEM((tm, d_out), jnp.float32)],
        ),
        out_shape=jax.ShapeDtypeStruct((m_pad, d_out), out_dtype),
        compiler_params=pltpu.CompilerParams(
            dimension_semantics=("parallel", "arbitrary"),
            vmem_limit_bytes=vmem_limit_bytes,
        ),
    )(xc, w1c, b1f, w2c, b2f)

    if m_pad != m:
        out = out[:m]
    return out.reshape(*orig_shape[:-1], d_out)


# ---------------------------------------------------------------------------
# Deterministic PyTorch-style init + pure-JAX reference
# ---------------------------------------------------------------------------
def init_params(key, dim):
    k1, k2, k3, k4 = jax.random.split(key, 4)
    hidden = 4 * dim
    bound1 = 1.0 / np.sqrt(dim)
    bound2 = 1.0 / np.sqrt(hidden)
    w1 = jax.random.uniform(k1, (dim, hidden), jnp.float32, -bound1, bound1)
    b1 = jax.random.uniform(k2, (hidden,), jnp.float32, -bound1, bound1)
    w2 = jax.random.uniform(k3, (hidden, dim), jnp.float32, -bound2, bound2)
    b2 = jax.random.uniform(k4, (dim,), jnp.float32, -bound2, bound2)
    return w1, b1, w2, b2


def reference_forward(x, w1, b1, w2, b2):
    h = x @ w1 + b1
    h = 0.5 * h * (1.0 + jax.lax.erf(h / np.sqrt(2.0)))
    return h @ w2 + b2


if __name__ == "__main__":
    B, N, dim = 2, 8, 32  # hidden = 4*dim = 128

    key = jax.random.PRNGKey(0)
    key, kx = jax.random.split(key)
    x = jax.random.normal(kx, (B, N, dim), jnp.float32)
    w1, b1, w2, b2 = init_params(key, dim)

    ref = reference_forward(x, w1, b1, w2, b2)

    # f32 MXU path, f32 output: tight tolerance.
    out_f32 = jax.block_until_ready(
        feedforward(x, w1, b1, w2, b2, compute_dtype=jnp.float32))
    np.testing.assert_allclose(np.asarray(out_f32), np.asarray(ref),
                               rtol=2e-4, atol=2e-4)

    # bf16 fast path: weights pre-cast ONCE (no per-call conversion pass), bf16 output
    # block (halves writeback / output double-buffering). bf16-rounding tolerance.
    w1_bf, w2_bf = w1.astype(jnp.bfloat16), w2.astype(jnp.bfloat16)
    out_bf16 = jax.block_until_ready(
        feedforward(x, w1_bf, b1, w2_bf, b2,
                    compute_dtype=jnp.bfloat16, out_dtype=jnp.bfloat16))
    np.testing.assert_allclose(np.asarray(out_bf16, dtype=np.float32),
                               np.asarray(ref), rtol=2e-2, atol=2e-2)

    print("KERNEL_OK")
</pallas_src>

<mosaic_0001>
module attributes {stable_mosaic.version = 11 : i64} {
  func.func @ffn_kernel(%arg0: i32, %arg1: i32, %arg2: memref<8x32xf32, #tpu.memory_space<vmem>>, %arg3: memref<32x128xf32, #tpu.memory_space<vmem>>, %arg4: memref<1x128xf32, #tpu.memory_space<vmem>>, %arg5: memref<128x32xf32, #tpu.memory_space<vmem>>, %arg6: memref<1x32xf32, #tpu.memory_space<vmem>>, %arg7: memref<8x32xf32, #tpu.memory_space<vmem>>, %arg8: memref<8x32xf32, #tpu.memory_space<vmem>>) attributes {dimension_semantics = [#tpu.dimension_semantics<parallel>, #tpu.dimension_semantics<arbitrary>], iteration_bounds = array<i64: 2, 1>, scalar_prefetch = 0 : i64, scratch_operands = 1 : i64, tpu.core_type = #tpu.core_type<tc>, window_params = [{transform_indices = @transform_0, window_bounds = array<i64: 8, 32>}, {transform_indices = @transform_1, window_bounds = array<i64: 32, 128>}, {transform_indices = @transform_2, window_bounds = array<i64: 1, 128>}, {transform_indices = @transform_3, window_bounds = array<i64: 128, 32>}, {pipeline_mode = #tpu.pipeline_mode<synchronous>, transform_indices = @transform_4, window_bounds = array<i64: 1, 32>}, {transform_indices = @transform_5, window_bounds = array<i64: 8, 32>}]} {
    %c0_i32 = arith.constant 0 : i32
    %0 = arith.cmpi eq, %arg1, %c0_i32 : i32
    %1 = arith.extui %0 : i1 to i32
    %c0_i32_0 = arith.constant 0 : i32
    %2 = arith.cmpi ne, %1, %c0_i32_0 : i32
    scf.if %2 {
      %cst_18 = arith.constant 0.000000e+00 : f32
      %25 = vector.broadcast %cst_18 : f32 to vector<8x32xf32>
      %c0_19 = arith.constant 0 : index
      %c0_20 = arith.constant 0 : index
      %26 = vector.load %arg8[%c0_19, %c0_20] : memref<8x32xf32, #tpu.memory_space<vmem>>, vector<8x32xf32>
      tpu.vector_store %arg8[%c0_19, %c0_20], %25 {strides = array<i32>} : memref<8x32xf32, #tpu.memory_space<vmem>>, vector<8x32xf32>,
    } else {
    }
    %c0 = arith.constant 0 : index
    %c0_1 = arith.constant 0 : index
    %3 = vector.load %arg2[%c0, %c0_1] : memref<8x32xf32, #tpu.memory_space<vmem>>, vector<8x32xf32>
    %c0_2 = arith.constant 0 : index
    %c0_3 = arith.constant 0 : index
    %4 = vector.load %arg3[%c0_2, %c0_3] : memref<32x128xf32, #tpu.memory_space<vmem>>, vector<32x128xf32>
    %cst = arith.constant dense<0.000000e+00> : vector<8x128xf32>
    %5 = tpu.matmul %3, %4, %cst {dimension_numbers = #tpu.dot_dimension_numbers<[1], [0], [0], [1], [0, 0, 1, 1], [], []>} : vector<8x32xf32>, vector<32x128xf32>, vector<8x128xf32> -> vector<8x128xf32>
    %c0_4 = arith.constant 0 : index
    %c0_5 = arith.constant 0 : index
    %6 = vector.load %arg4[%c0_4, %c0_5] : memref<1x128xf32, #tpu.memory_space<vmem>>, vector<1x128xf32>
    %7 = vector.broadcast %6 : vector<1x128xf32> to vector<8x128xf32>
    %8 = arith.addf %5, %7 : vector<8x128xf32>
    %cst_6 = arith.constant 5.000000e-01 : f32
    %9 = vector.broadcast %cst_6 : f32 to vector<8x128xf32>
    %10 = arith.mulf %9, %8 : vector<8x128xf32>
    %cst_7 = arith.constant 0.707106769 : f32
    %11 = vector.broadcast %cst_7 : f32 to vector<8x128xf32>
    %12 = arith.mulf %8, %11 : vector<8x128xf32>
    %13 = math.erf %12 : vector<8x128xf32>
    %cst_8 = arith.constant 1.000000e+00 : f32
    %14 = vector.broadcast %cst_8 : f32 to vector<8x128xf32>
    %15 = arith.addf %14, %13 : vector<8x128xf32>
    %16 = arith.mulf %10, %15 : vector<8x128xf32>
    %c0_9 = arith.constant 0 : index
    %c0_10 = arith.constant 0 : index
    %17 = vector.load %arg8[%c0_9, %c0_10] : memref<8x32xf32, #tpu.memory_space<vmem>>, vector<8x32xf32>
    %c0_11 = arith.constant 0 : index
    %c0_12 = arith.constant 0 : index
    %18 = vector.load %arg5[%c0_11, %c0_12] : memref<128x32xf32, #tpu.memory_space<vmem>>, vector<128x32xf32>
    %cst_13 = arith.constant dense<0.000000e+00> : vector<8x32xf32>
    %19 = tpu.matmul %16, %18, %cst_13 {dimension_numbers = #tpu.dot_dimension_numbers<[1], [0], [0], [1], [0, 0, 1, 1], [], []>} : vector<8x128xf32>, vector<128x32xf32>, vector<8x32xf32> -> vector<8x32xf32>
    %20 = arith.addf %17, %19 : vector<8x32xf32>
    %c0_14 = arith.constant 0 : index
    %c0_15 = arith.constant 0 : index
    %21 = vector.load %arg8[%c0_14, %c0_15] : memref<8x32xf32, #tpu.memory_space<vmem>>, vector<8x32xf32>
    tpu.vector_store %arg8[%c0_14, %c0_15], %20 {strides = array<i32>} : memref<8x32xf32, #tpu.memory_space<vmem>>, vector<8x32xf32>,
    %c0_i32_16 = arith.constant 0 : i32
    %22 = arith.cmpi eq, %arg1, %c0_i32_16 : i32
    %23 = arith.extui %22 : i1 to i32
    %c0_i32_17 = arith.constant 0 : i32
    %24 = arith.cmpi ne, %23, %c0_i32_17 : i32
    scf.if %24 {
      %c0_18 = arith.constant 0 : index
      %c0_19 = arith.constant 0 : index
      %25 = vector.load %arg8[%c0_18, %c0_19] : memref<8x32xf32, #tpu.memory_space<vmem>>, vector<8x32xf32>
      %c0_20 = arith.constant 0 : index
      %c0_21 = arith.constant 0 : index
      %26 = vector.load %arg6[%c0_20, %c0_21] : memref<1x32xf32, #tpu.memory_space<vmem>>, vector<1x32xf32>
      %27 = vector.broadcast %26 : vector<1x32xf32> to vector<8x32xf32>
      %28 = arith.addf %25, %27 : vector<8x32xf32>
      %c0_22 = arith.constant 0 : index
      %c0_23 = arith.constant 0 : index
      %29 = vector.load %arg7[%c0_22, %c0_23] : memref<8x32xf32, #tpu.memory_space<vmem>>, vector<8x32xf32>
      tpu.vector_store %arg7[%c0_22, %c0_23], %28 {strides = array<i32>} : memref<8x32xf32, #tpu.memory_space<vmem>>, vector<8x32xf32>,
    } else {
    }
    return
  }
  func.func @transform_0(%arg0: i32, %arg1: i32) -> (i32, i32) {
    %c0_i32 = arith.constant 0 : i32
    %c0_i32_0 = arith.constant 0 : i32
    return %arg0, %c0_i32 : i32, i32
  }
  func.func @transform_1(%arg0: i32, %arg1: i32) -> (i32, i32) {
    %c0_i32 = arith.constant 0 : i32
    %c0_i32_0 = arith.constant 0 : i32
    return %c0_i32, %arg1 : i32, i32
  }
  func.func @transform_2(%arg0: i32, %arg1: i32) -> (i32, i32) {
    %c0_i32 = arith.constant 0 : i32
    %c0_i32_0 = arith.constant 0 : i32
    return %c0_i32, %arg1 : i32, i32
  }
  func.func @transform_3(%arg0: i32, %arg1: i32) -> (i32, i32) {
    %c0_i32 = arith.constant 0 : i32
    %c0_i32_0 = arith.constant 0 : i32
    return %arg1, %c0_i32 : i32, i32
  }
  func.func @transform_4(%arg0: i32, %arg1: i32) -> (i32, i32) {
    %c0_i32 = arith.constant 0 : i32
    %c0_i32_0 = arith.constant 0 : i32
    %c0_i32_1 = arith.constant 0 : i32
    return %c0_i32, %c0_i32_0 : i32, i32
  }
  func.func @transform_5(%arg0: i32, %arg1: i32) -> (i32, i32) {
    %c0_i32 = arith.constant 0 : i32
    %c0_i32_0 = arith.constant 0 : i32
    return %arg0, %c0_i32 : i32, i32
  }
}

</mosaic_0001>

<bundles_post_ra>
// kernel: tpu_custom_call.1
= control target key start
LH: loop header
LB: loop body
LE: loop exit
PB: predicated region body
PF: predicated region fallthrough
CT: control target
= control target key end

     0   :  { %10 = vsyncpa [#allocation4], 0  ;;  %s896_s0 = inlined_call_operand.vmem [shape: f32[16,32], index: 0, kind: input, shape index: {}]   ;;  %s897_s1 = inlined_call_operand.vmem [shape: f32[32,128], index: 1, kind: input, shape index: {}]   ;;  %s898_s2 = inlined_call_operand.vmem [shape: f32[1,128], index: 2, kind: input, shape index: {}]   ;;  %s899_s3 = inlined_call_operand.vmem [shape: f32[128,32], index: 3, kind: input, shape index: {}]   ;;  %s900_s4 = inlined_call_operand.vmem [shape: f32[1,32], index: 4, kind: input, shape index: {}]   ;;  %s901_s5 = inlined_call_operand.hbm [shape: f32[16,32], index: 5, kind: output, shape index: {}]  }
   0x1   :  { %12 = vsyncpa [#allocation4 + $0x1], 0  ;;  %s729_s18 = smov 0   ;;  %s731_s19 = smov 0  }
   0x2   :  { %s733_s20 = smov 0   ;;  %s735_s21 = smov 0  }
   0x3   :  { %s737_s22 = smov 0   ;;  %s739_s23 = smov 0  }
   0x4 LB: > { %s542_s24 = sadd.s32 4294967295, %s696_s23   ;;  %s543_s25 = sadd.s32 4294967294, %s696_s23   ;;  %s696_s23 = sphi %s739_s23, %s18_s23   ;;  %s692_s22 = sphi %s737_s22, %s908_s22   ;;  %s688_s21 = sphi %s735_s21, %s907_s21   ;;  %s684_s20 = sphi %s733_s20, %s906_s20   ;;  %s680_s19 = sphi %s731_s19, %s905_s19   ;;  %s676_s18 = sphi %s729_s18, %s904_s18  }
   0x5   : > { %s30_s26 = sadd.s32 1, %s692_s22  ;;  %s162_s27 = sadd.s32 1, %s684_s20 }
   0x6   : > { %p32_p0 = scmp.ge.s32.totalorder %s30_s26, 2  ;;  %p172_p1 = scmp.ne.s32.totalorder %s684_s20, %s680_s19 }
   0x7   : > { %p173_p2 = scmp.eq.s32.totalorder %s542_s24, 1  ;;  %p178_p3 = scmp.ne.s32.totalorder %s680_s19, %s676_s18 }
   0x8   : > { %s910_s26 = smov (%p32_p0, %s30_s26), 0  ;;  %p179_p5 = scmp.eq.s32.totalorder %s543_s25, 1 }
   0x9   : > { %p769_p4 = por %p173_p2, %p172_p1  ;;  %s159_s29 = ssub.s32 %s692_s22, %s910_s26 }
   0xa   : > { %p549_p6 = scmp.ge.s32.totalorder %s696_s23, 1  ;;  %p160_p7 = scmp.eq.s32.totalorder %s159_s29, 0 }
   0xb   : > { %p776_p8 = por %p179_p5, %p178_p3  ;;  %p229_p9 = scmp.lt.s32.totalorder %s696_s23, 3 }
   0xc   : > { %s782_s6 = scalar_select %p160_p7, %s684_s20, %s162_s27  }
   0xd   : > { %p230_p10 = pnand %p549_p6, %p229_p9 }
   0xe   : > { %p268_p11 = scmp.lt.s32.totalorder (!%p230_p10), %s688_s21, 1  ;;  %s265_s9 = sand.u32 (!%p230_p10), 1, %s680_s19  }
   0xf   : > { %233 = sbr.rel (%p230_p10) target bundleno = 348 (0x15c), region = 40  ;;  %s550_s10 = sshll.u32 (!%p230_p10), %s265_s9, 3 }
  0x10   : > { %s555_s11 = sshll.u32 (!%p230_p10), %s688_s21, 3  ;;  %s267_s17 = scalar_lea.vmem (!%p230_p10), [#allocation3], %s550_s10 }
  0x11   : > { %s428_s14 = scalar_lea.hbm (!%p230_p10), %s901_s5, %s555_s11  ;;  %s430_s24 = sshll.u32 (!%p230_p10), %s267_s17, 4  ;;  %s431_s24 = int_to_ptr.vmem [resolvable:$true] %s430_s24 }
  0x12   : > { %s638_s10 = scalar_lea.hbm (!%p230_p10), %s901_s5, 16 }
  0x14   : > { %v295_v0 = vld [vmem:[%s897_s1 + $0x18] sm:$0xff]  ;;  %v294_v1 = vld [vmem:[%s897_s1 + $0x10] sm:$0xff]  ;;  %vm289_vm0 = vcmask 261120   ;;  %v698_v2 = vmov 0.0   ;;  %v293_v3 = vld [vmem:[%s897_s1 + $0x8] sm:$0xff]  ;;  %s269_s13 = scalar_select %p268_p11, %s688_s21, 1 }
  0x15   : > { %316 = vmatpush.msra.mxu0 %v295_v0  ;;  %290 = vst.msk [vmem:[#allocation2] sm:$0xff] %vm289_vm0, %v698_v2  ;;  %v292_v4 = vld [vmem:[%s897_s1] sm:$0xff]  ;;  %v384_v6 = vld [vmem:[%s899_s3 + $0x78] sm:$0xff]  ;;  %v383_v7 = vld [vmem:[%s899_s3 + $0x70] sm:$0xff]  ;;  %s418_s21 = scalar_lea.sflag [#allocation4], %s265_s9 }
  0x16   : > { %s551_s16 = sshll.u32 %s269_s13, 3  ;;  %385 = vmatpush.msra.mxu1 %v384_v6  ;;  %v382_v8 = vld [vmem:[%s899_s3 + $0x68] sm:$0xff]  ;;  %v381_v9 = vld [vmem:[%s899_s3 + $0x60] sm:$0xff]  ;;  %v380_v11 = vld [vmem:[%s899_s3 + $0x58] sm:$0xff] }
  0x17   : > { %317 = vmatpush.msra.mxu0 %v294_v1  ;;  %s271_s25 = scalar_lea.vmem %s896_s0, %s551_s16  ;;  %v614_v10 = vld [vmem:[%s898_s2] ss:$0 sm:$0xff]  ;;  %v379_v12 = vld [vmem:[%s899_s3 + $0x50] sm:$0xff]  ;;  %v378_v14 = vld [vmem:[%s899_s3 + $0x48] sm:$0xff] }
  0x18   : > { %v291_v5 = vld [vmem:[%s271_s25] sm:$0xff]  ;;  %386 = vmatpush.msra.mxu1 %v383_v7  ;;  %v376_v18 = vld [vmem:[%s899_s3 + $0x38] sm:$0xff]  ;;  %v375_v20 = vld [vmem:[%s899_s3 + $0x30] sm:$0xff]  ;;  %s432_s25 = sshll.u32 %s428_s14, 4  ;;  %s433_s25 = int_to_ptr.hbm [resolvable:$true] %s432_s25 }
  0x19   : > { %318 = vmatpush.msra.mxu0 %v293_v3  ;;  %v377_v16 = vld [vmem:[%s899_s3 + $0x40] sm:$0xff]  ;;  %v374_v22 = vld [vmem:[%s899_s3 + $0x28] sm:$0xff]  ;;  %v372_v28 = vld [vmem:[%s899_s3 + $0x18] sm:$0xff]  ;;  %s632_s27 = sshra.s32 %s433_s25, 4  ;;  %s633_s27 = int_to_ptr.hbm [resolvable:$true] %s632_s27 }
  0x1a   : > { %387 = vmatpush.msra.mxu1 %v382_v8  ;;  %v373_v25 = vld [vmem:[%s899_s3 + $0x20] sm:$0xff]  ;;  %v371_v31 = vld [vmem:[%s899_s3 + $0x10] sm:$0xff]  ;;  %v370_v34 = vld [vmem:[%s899_s3 + $0x8] sm:$0xff]  ;;  %s634_s29 = scalar_lea.hbm %s633_s27, 8  ;;  %p639_p1 = scmp.lt.s32.totalorder %s633_s27, %s901_s5 }
  0x1b   : > { %319 = vmatpush.msra.mxu0 %v292_v4  ;;  %v369_v36 = vld [vmem:[%s899_s3] sm:$0xff]  ;;  %p635_p12 = scmp.ne.s32.totalorder %s633_s27, %s634_s29  ;;  %p640_p2 = scmp.lt.s32.totalorder %s638_s10, %s634_s29 }
  0x1c   : > { %552 = vmatmul.msk.f32.vlgmr.msra.gmra.mxu0 %vm289_vm0, %v291_v5  ;;  %388 = vmatpush.msra.mxu1 %v381_v9  ;;  %v368_v0 = vld [vmem:[#allocation2] sm:$0xff] }
  0x1d   : > { %v615_v3 = vld [vmem:[%s900_s4] ss:$0 sm:$0xff]  ;;  %p636_p13 = pnand %p635_p12, %p769_p4  ;;  %p641_p3 = por %p640_p2, %p639_p1 }
  0x1e   : > { %389 = vmatpush.msra.mxu1 %v380_v11 }
  0x1f   : > { %p637_p0 = pneg %p636_p13 }
  0x20   : > { %390 = vmatpush.msra.mxu1 %v379_v12 }
  0x21   : > { %p642_p5 = pnand %p641_p3, %p637_p0 }
  0x22   : > { %391 = vmatpush.msra.mxu1 %v378_v14 }
  0x24   : > { %392 = vmatpush.msra.mxu1 %v377_v16 }
  0x26   : > { %393 = vmatpush.msra.mxu1 %v376_v18 }
  0x28   : > { %394 = vmatpush.msra.mxu1 %v375_v20 }
  0x2a   : > { %395 = vmatpush.msra.mxu1 %v374_v22 }
  0x2c   : > { %396 = vmatpush.msra.mxu1 %v373_v25 }
  0x2e   : > { %397 = vmatpush.msra.mxu1 %v372_v28 }
  0x30   : > { %398 = vmatpush.msra.mxu1 %v371_v31 }
  0x32   : > { %399 = vmatpush.msra.mxu1 %v370_v34 }
  0x34   : > { %400 = vmatpush.msra.mxu1 %v369_v36 }
  0x99   : > { %v321_v13 = vpop.f32.mrf.mxu0 }
  0x9a   : > { %v322_v15 = vadd.f32 %v614_v10, %v321_v13 }
  0x9c   : > { %v325_v17 = vmul.f32 0.70710677, %v322_v15  ;;  %v324_v61 = vmul.f32 0.5, %v322_v15 }
  0x9e   : > { %v326_v19 = vmul.f32 %v325_v17, %v325_v17 }
  0xa0   : > { %v327_v21 = vmin.f32 %v326_v19, 16.0 }
  0xa2   : > { %v328_v23 = vmul.f32 2.1237322e-06, %v327_v21  ;;  %v339_v24 = vmul.f32 3.8918573e-05, %v327_v21 }
  0xa4   : > { %v329_v26 = vadd.f32 0.00028619796, %v328_v23  ;;  %v340_v27 = vadd.f32 0.001143296, %v339_v24 }
  0xa6   : > { %v330_v29 = vmul.f32 %v329_v26, %v327_v21  ;;  %v341_v30 = vmul.f32 %v340_v27, %v327_v21 }
  0xa8   : > { %v342_v32 = vadd.f32 0.014752088, %v341_v30  ;;  %v331_v33 = vadd.f32 0.0036580483, %v330_v29 }
  0xaa   : > { %v343_v35 = vmul.f32 %v342_v32, %v327_v21  ;;  %v332_v38 = vmul.f32 %v331_v33, %v327_v21 }
  0xac   : > { %v344_v37 = vadd.f32 0.112945676, %v343_v35  ;;  %v333_v41 = vadd.f32 0.05243302, %v332_v38 }
  0xae   : > { %v345_v39 = vmul.f32 %v344_v37, %v327_v21  ;;  %v334_v44 = vmul.f32 %v333_v41, %v327_v21 }
  0xb0   : > { %v346_v40 = vadd.f32 0.4994258, %v345_v39  ;;  %v335_v45 = vadd.f32 0.18741608, %v334_v44 }
  0xb2   : > { %v347_v42 = vmul.f32 %v346_v40, %v327_v21  ;;  %v336_v47 = vmul.f32 %v335_v45, %v327_v21 }
  0xb4   : > { %v348_v43 = vadd.f32 1.0, %v347_v42  ;;  %v337_v51 = vadd.f32 1.1283791, %v336_v47 }
  0xb6   : > { %616 = vrcp.f32 %v348_v43  ;;  %v360_v50 = vand.u32 2147483648, %v348_v43  ;;  %v358_v53 = vand.u32 2147483647, %v348_v43  ;;  %vm354_vm2 = vweird.f32 %v348_v43 }
  0xb7   : > { %v338_v56 = vmul.f32 %v337_v51, %v325_v17 }
  0xb8   : > { %v361_v55 = vor.u32 1.1754944e-38, %v360_v50  ;;  %vm359_vm4 = vcmp.eq.f32.partialorder %v358_v53, 8.507059e+37 }
  0xbc   : > { %v617_v46 = vpop.eup %616 }
  0xbd   : > { %v350_v48 = vmul.f32 %v617_v46, %v348_v43  ;;  %vm355_vm1 = vweird.f32 %v617_v46 }
  0xbe   : > { %vm356_vm3 = vmor %vm354_vm2, %vm355_vm1 }
  0xbf   : > { %v351_v49 = vsub.f32 1.0, %v350_v48 }
  0xc1   : > { %v352_v52 = vmul.f32 %v617_v46, %v351_v49 }
  0xc3   : > { %v353_v54 = vadd.f32 %v617_v46, %v352_v52 }
  0xc5   : > { %v357_v57 = vsel %vm356_vm3, %v617_v46, %v353_v54 }
  0xc6   : > { %v362_v58 = vsel %vm359_vm4, %v361_v55, %v357_v57 }
  0xc7   : > { %v363_v59 = vmul.f32 %v362_v58, %v338_v56 }
  0xc9   : > { %v553_v60 = vclamps-f32 %v363_v59, 1.0 }
  0xcb   : > { %v366_v62 = vadd.f32 1.0, %v553_v60 }
  0xcd   : > { %v367_v63 = vmul.f32 %v366_v62, %v324_v61 }
  0xcf   : > { %401 = vmatmul.f32.vlgmr.msra.gmra.mxu1 %v367_v63 }
 0x14c   : > { %v402_v1 = vpop.f32.mrf.mxu1 }
 0x14d   : > { %v405_v2 = vadd.f32 %v402_v1, %v368_v0 }
 0x14f   : > { %406 = vst.msk [vmem:[#allocation2] sm:$0xff] %vm289_vm0, %v405_v2 }
 0x156   : > { %v410_v4 = vld [vmem:[#allocation2] sm:$0xff] }
 0x157   : > { %v415_v5 = vadd.f32 %v615_v3, %v410_v4 }
 0x159   : > { %416 = vst.msk [vmem:[%s267_s17] sm:$0xff] %vm289_vm0, %v415_v5 }
 0x15a   : > { %645 = shalt.err (!%p642_p5)
}
 0x15b   : > { %558 = dma.vmem_to_hbm [thread:$0]  (%p769_p4), %s431_s24, 128, %s433_s25, %s418_s21  }
 0x15c PF: > { %p564_p6 = scmp.ge.s32.totalorder %s696_s23, 2  ;;  %s444_s9 = sand.u32 1, %s676_s18  }
 0x15d   : > { %s445_s13 = scalar_lea.sflag [#allocation4], %s444_s9 }
 0x15e   : > { %p561_p7 = pnand %p564_p6, %p776_p8 }
 0x160   : > { %p562_p9 = pneg %p561_p7 }
 0x162   : > { %671 = dma.done.wait (%p562_p9), %s445_s13, 128  }
 0x163   : > { %673 = vsyncadd (%p562_p9), %s445_s13, 4294967168  ;;  %s18_s23 = sadd.s32 1, %s696_s23   ;;  %s904_s18 = smov %s680_s19 }
 0x164   : > { %p15_p10 = scmp.ge.s32.totalorder %s18_s23, 4   ;;  %s905_s19 = smov %s684_s20 }
 0x165   : > { %s906_s20 = smov %s782_s6  ;;  %s907_s21 = smov %s692_s22 }
 0x166   : > { %s908_s22 = smov %s910_s26  ;;  %17 = sbr.rel (!%p15_p10) target bundleno = 4 (0x4), region = 92 }
 0x16b   :  { %451 = vsyncpa [#allocation4], 1 }
 0x16c   :  { %453 = vsyncpa [#allocation4 + $0x1], 1 }

</bundles_post_ra>
